<compile_context>
chip_gen: v7x
topology: tpu7x:2x2x1
jax: 0.10.0
libtpu: 0.0.40
codegen_flags: <defaults>
</compile_context>

<pallas_src>
import functools

import jax
import jax.numpy as jnp
from jax.experimental import pallas as pl
from jax.experimental.pallas import tpu as pltpu

_LANES = 128
_SUBLANES = 32  # covers f32 (8,128), bf16 (16,128), int8/fp8 (32,128) tiling


def _one_over_sqr_kernel(x_ref, o_ref, *, inv_w2, norm_factor, c):
    # Load in the original dtype, compute in f32 (v5e has no bf16 VPU/EUP),
    # cast back on store.
    x = x_ref[...].astype(jnp.float32)
    denom = 1.0 + (x * x) * inv_w2          # (x/w)^2 with 1/w^2 pre-folded
    y = norm_factor * pl.reciprocal(denom, approx=False) + c
    o_ref[...] = y.astype(o_ref.dtype)


def _choose_tile_rows(rows, requested):
    """Pick a sublane-aligned row tile; guarantee >=2 grid steps when possible."""
    if rows <= _SUBLANES:
        return rows                                   # single full-extent block
    req = max(_SUBLANES, (int(requested) // _SUBLANES) * _SUBLANES)
    half = -(-rows // 2)                              # ceil(rows / 2)
    half = -(-half // _SUBLANES) * _SUBLANES          # round up to sublane mult
    return min(req, half)


def one_over_sqr(x, w=1.0, c=0.0, normalize=False, tile_rows=4096):
    """Pallas TPU implementation of OneOverSqr.forward (any input shape)."""
    norm_factor = (1.0 / (2.0 * float(w))) if normalize else 1.0
    inv_w2 = 1.0 / (float(w) * float(w))

    orig_shape = x.shape
    orig_dtype = x.dtype
    n = x.size
    if n == 0:
        return x

    rows = pl.cdiv(n, _LANES)
    tail = rows * _LANES - n

    xf = jnp.ravel(x)
    if tail:
        # Only the tiny (<128 element) tail is padded; the common
        # n % 128 == 0 case is a zero-copy reshape.
        xf = jnp.pad(xf, (0, tail))
    x2d = xf.reshape(rows, _LANES)

    tr = _choose_tile_rows(rows, tile_rows)
    grid = (pl.cdiv(rows, tr),)

    kernel = functools.partial(
        _one_over_sqr_kernel,
        inv_w2=inv_w2,
        norm_factor=float(norm_factor),
        c=float(c),
    )

    out2d = pl.pallas_call(
        kernel,
        out_shape=jax.ShapeDtypeStruct((rows, _LANES), orig_dtype),
        grid=grid,
        in_specs=[pl.BlockSpec((tr, _LANES), lambda i: (i, 0))],
        out_specs=pl.BlockSpec((tr, _LANES), lambda i: (i, 0)),
        compiler_params=pltpu.CompilerParams(
            dimension_semantics=("parallel",)),
    )(x2d)

    if tail:
        return out2d.reshape(-1)[:n].reshape(orig_shape)
    return out2d.reshape(orig_shape)


def one_over_sqr_reference(x, w=1.0, c=0.0, normalize=False):
    """Pure-JAX mirror of the PyTorch OneOverSqr.forward (f32 math)."""
    norm_factor = (1.0 / (2.0 * w)) if normalize else 1.0
    xf = x.astype(jnp.float32)
    return (norm_factor * (1.0 + (xf / w) ** 2) ** -1 + c).astype(x.dtype)


if __name__ == "__main__":
    key = jax.random.PRNGKey(0)
    configs = [
        dict(w=1.0, c=0.0, normalize=False),   # module defaults
        dict(w=2.5, c=0.3, normalize=True),    # exercise all hyperparameters
    ]

    # Main case: module-sized f32 input, size divisible by 128 (zero-copy path).
    x = jax.random.normal(key, (2, 4, 16, 16), dtype=jnp.float32) * 3.0
    for cfg in configs:
        out = jax.block_until_ready(one_over_sqr(x, **cfg))
        ref = one_over_sqr_reference(x, **cfg)
        assert out.shape == x.shape and out.dtype == x.dtype
        assert jnp.allclose(out, ref, atol=1e-5, rtol=1e-5), cfg

    # Ragged last grid block (rows not a multiple of the tile).
    x2 = jax.random.normal(jax.random.PRNGKey(1), (4, 4, 128, 33),
                           dtype=jnp.float32) * 2.0
    out = jax.block_until_ready(one_over_sqr(x2, w=2.5, c=0.3, normalize=True))
    ref = one_over_sqr_reference(x2, w=2.5, c=0.3, normalize=True)
    assert jnp.allclose(out, ref, atol=1e-5, rtol=1e-5)

    # Element count not a multiple of 128 (tiny tail pad path).
    x3 = jax.random.normal(jax.random.PRNGKey(2), (3, 17, 5),
                           dtype=jnp.float32)
    out = jax.block_until_ready(one_over_sqr(x3, w=1.0, c=0.0))
    ref = one_over_sqr_reference(x3, w=1.0, c=0.0)
    assert out.shape == x3.shape
    assert jnp.allclose(out, ref, atol=1e-5, rtol=1e-5)

    # bf16 input streamed natively through the kernel (f32 compute inside).
    xb = (jax.random.normal(jax.random.PRNGKey(3), (2, 4, 16, 16),
                            dtype=jnp.float32) * 3.0).astype(jnp.bfloat16)
    out = jax.block_until_ready(one_over_sqr(xb, w=2.5, c=0.3, normalize=True))
    ref = one_over_sqr_reference(xb, w=2.5, c=0.3, normalize=True)
    assert out.dtype == jnp.bfloat16
    assert jnp.allclose(out.astype(jnp.float32), ref.astype(jnp.float32),
                        atol=2e-2, rtol=2e-2)

    print("KERNEL_OK")
</pallas_src>

<mosaic_0001>
module attributes {stable_mosaic.version = 11 : i64} {
  func.func @_one_over_sqr_kernel(%arg0: i32, %arg1: memref<16x128xf32, #tpu.memory_space<vmem>>, %arg2: memref<16x128xf32, #tpu.memory_space<vmem>>) attributes {dimension_semantics = [#tpu.dimension_semantics<parallel>], iteration_bounds = array<i64: 1>, scalar_prefetch = 0 : i64, scratch_operands = 0 : i64, tpu.core_type = #tpu.core_type<tc>, window_params = [{transform_indices = @transform_0, window_bounds = array<i64: 16, 128>}, {transform_indices = @transform_1, window_bounds = array<i64: 16, 128>}]} {
    %c0 = arith.constant 0 : index
    %c0_0 = arith.constant 0 : index
    %0 = vector.load %arg1[%c0, %c0_0] : memref<16x128xf32, #tpu.memory_space<vmem>>, vector<16x128xf32>
    %1 = arith.mulf %0, %0 : vector<16x128xf32>
    %cst = arith.constant 1.000000e+00 : f32
    %2 = vector.broadcast %cst : f32 to vector<16x128xf32>
    %3 = arith.mulf %1, %2 : vector<16x128xf32>
    %cst_1 = arith.constant 1.000000e+00 : f32
    %4 = vector.broadcast %cst_1 : f32 to vector<16x128xf32>
    %5 = arith.addf %4, %3 : vector<16x128xf32>
    %6 = tpu.reciprocal %5 : vector<16x128xf32> -> vector<16x128xf32>
    %cst_2 = arith.constant 1.000000e+00 : f32
    %7 = vector.broadcast %cst_2 : f32 to vector<16x128xf32>
    %8 = arith.mulf %7, %6 : vector<16x128xf32>
    %cst_3 = arith.constant 0.000000e+00 : f32
    %9 = vector.broadcast %cst_3 : f32 to vector<16x128xf32>
    %10 = arith.addf %8, %9 : vector<16x128xf32>
    %c0_4 = arith.constant 0 : index
    %c0_5 = arith.constant 0 : index
    %11 = vector.load %arg2[%c0_4, %c0_5] : memref<16x128xf32, #tpu.memory_space<vmem>>, vector<16x128xf32>
    tpu.vector_store %arg2[%c0_4, %c0_5], %10 {strides = array<i32>} : memref<16x128xf32, #tpu.memory_space<vmem>>, vector<16x128xf32>,
    return
  }
  func.func @transform_0(%arg0: i32) -> (i32, i32) {
    %c0_i32 = arith.constant 0 : i32
    %c0_i32_0 = arith.constant 0 : i32
    return %arg0, %c0_i32 : i32, i32
  }
  func.func @transform_1(%arg0: i32) -> (i32, i32) {
    %c0_i32 = arith.constant 0 : i32
    %c0_i32_0 = arith.constant 0 : i32
    return %arg0, %c0_i32 : i32, i32
  }
}

</mosaic_0001>

<bundles_post_ra>
// kernel: tpu_custom_call.1
= control target key start
LH: loop header
LB: loop body
LE: loop exit
PB: predicated region body
PF: predicated region fallthrough
CT: control target
= control target key end

     0   :  { %6 = vsyncpa [#allocation3], 0  ;;  %s152_s0 = inlined_call_operand.hbm [shape: f32[16,128], index: 0, kind: input, shape index: {}]   ;;  %s153_s1 = inlined_call_operand.hbm [shape: f32[16,128], index: 1, kind: output, shape index: {}]  }
   0x1   :  { %7 = vsyncpa [#allocation4], 0  ;;  %s108_s6 = smov [#allocation2]   ;;  %s60_s10 = scalar_lea.hbm %s152_s0, 256 }
   0x2   :  { %s13_s7 = sshll.u32 %s108_s6, 4  ;;  %p61_p0 = scmp.ne.s32.totalorder %s152_s0, %s60_s10  ;;  %s14_s7 = int_to_ptr.vmem [resolvable:$true] %s13_s7 }
   0x3   :  { %p64_p1 = scmp.lt.u32.totalorder %s60_s10, %s152_s0 }
   0x5   :  { %p66_p2 = pnand %p64_p1, %p61_p0 }
   0x7   :  { %69 = shalt.err (!%p66_p2)
}
   0x8   :  { %s70_s15 = scalar_lea.vmem %s14_s7, 256  ;;  %p75_p4 = scmp.lt.s32.totalorder %s14_s7, %s14_s7 }
   0x9   :  { %p71_p3 = scmp.ne.s32.totalorder %s14_s7, %s70_s15  ;;  %p76_p5 = scmp.lt.s32.totalorder %s70_s15, %s70_s15 }
   0xb   :  { %p77_p6 = por %p76_p5, %p75_p4 }
   0xd   :  { %p78_p7 = pnand %p77_p6, %p71_p3 }
   0xf   :  { %81 = shalt.err (!%p78_p7)
}
  0x10   :  { %s109_s16 = smov 128   ;;  %s110_s17 = smov 8  }
  0x11   :  { %19 = dma.hbm_to_vmem [thread:$0]  %s152_s0, 256, %s14_s7, [#allocation3], %s109_s16, %s109_s16, %s110_s17  }
  0x12   :  { %104 = dma.done.wait [#allocation3], 256  }
  0x13   :  { %105 = vsyncadd [#allocation3], 4294967040  ;;  %v23_v0 = vld [vmem:[#allocation2] sm:$0xff]  ;;  %v24_v1 = vld [vmem:[#allocation2 + $0x8] sm:$0xff]  ;;  %s111_s20 = smov [#allocation5]  }
  0x14   :  { %v25_v2 = vmul.f32 %v23_v0, %v23_v0  ;;  %v26_v3 = vmul.f32 %v24_v1, %v24_v1  ;;  %s40_s21 = sshll.u32 %s111_s20, 4  ;;  %s41_s21 = int_to_ptr.vmem [resolvable:$true] %s40_s21 }
  0x15   :  { %s82_s22 = scalar_lea.vmem %s41_s21, 256  ;;  %p87_p9 = scmp.lt.s32.totalorder %s41_s21, %s41_s21 }
  0x16   :  { %v27_v4 = vadd.f32 1.0, %v25_v2  ;;  %v28_v5 = vadd.f32 1.0, %v26_v3  ;;  %p83_p8 = scmp.ne.s32.totalorder %s41_s21, %s82_s22  ;;  %p88_p10 = scmp.lt.s32.totalorder %s82_s22, %s82_s22 }
  0x18   :  { %56 = vrcp.f32 %v27_v4  ;;  %p89_p11 = por %p88_p10, %p87_p9 }
  0x19   :  { %58 = vrcp.f32 %v28_v5 }
  0x1a   :  { %p90_p12 = pnand %p89_p11, %p83_p8 }
  0x22   :  { %v57_v6 = vpop.eup %56 }
  0x23   :  { %v59_v7 = vpop.eup %58  ;;  %33 = vst [vmem:[#allocation5] sm:$0xff] %v57_v6 }
  0x24   :  { %34 = vst [vmem:[#allocation5 + $0x8] sm:$0xff] %v59_v7 }
  0x25   :  { %93 = shalt.err (!%p90_p12)
}
  0x26   :  { %s94_s24 = scalar_lea.hbm %s153_s1, 256 }
  0x27   :  { %p95_p13 = scmp.ne.s32.totalorder %s153_s1, %s94_s24  ;;  %p98_p0 = scmp.lt.u32.totalorder %s94_s24, %s153_s1 }
  0x29   :  { %p100_p1 = pnand %p98_p0, %p95_p13 }
  0x2b   :  { %103 = shalt.err (!%p100_p1)
}
  0x2c   :  { %46 = dma.vmem_to_hbm [thread:$0]  %s41_s21, 256, %s153_s1, [#allocation4], %s109_s16, %s109_s16, %s110_s17  }
  0x2d   :  { %106 = dma.done.wait [#allocation4], 256  }
  0x2e   :  { %107 = vsyncadd [#allocation4], 4294967040 }
  0x2f   :  { %50 = vsyncpa [#allocation3], 1 }
  0x30   :  { %51 = vsyncpa [#allocation4], 1 }

</bundles_post_ra>
